<compile_context>
chip_gen: v6e
topology: v6e:2x2x1
jax: 0.10.0
libtpu: 0.0.40
codegen_flags: <defaults>
</compile_context>

<pallas_src>
import functools

import jax
import jax.numpy as jnp
from jax.experimental import pallas as pl
from jax.experimental.pallas import tpu as pltpu

LANES = 128
MAX_TILE_R = 8192   # 8192x128 rows: 4 MiB f32 / 2 MiB bf16 / 1 MiB int8 per input
                    # buffer.  The f32 in-kernel intermediates (4 MiB) are the
                    # binding VMEM term, so rows are not scaled up further for
                    # narrow dtypes.
VMEM_LIMIT = 32 * 1024 * 1024


def _round_up(a, b):
    return (a + b - 1) // b * b


def _num_parallel_cores():
    """2 on parts where a 'parallel' grid axis shards across TensorCores."""
    try:
        kind = jax.devices()[0].device_kind.lower()
    except Exception:
        return 1
    if "v7" in kind or "v4" in kind or "v5p" in kind:
        return 2
    return 1   # v5e / v6e: single TensorCore per device


def _gray_loss_kernel(x_ref, o_ref, *, rows, tile_r, last_block, need_mask):
    core = pl.program_id(0)
    step = pl.program_id(1)

    # Zero this core's resident partial-sum block at the start of its sweep.
    @pl.when(step == 0)
    def _():
        o_ref[...] = jnp.zeros_like(o_ref)

    x = x_ref[...].astype(jnp.float32)
    vals = jnp.abs(x - 0.5)

    def fold(v):
        # Fold (tile_r, 128) into one (1, 8, 128) slab of per-lane partial sums
        # (elementwise VPU adds only; no cross-lane reduce per step).
        return jnp.sum(v.reshape(tile_r // 8, 8, LANES), axis=0)[None]

    if not need_mask:
        # Grid exactly covers the rows: unmasked accumulate everywhere.
        o_ref[...] += fold(vals)
    else:
        block_id = core * pl.num_programs(1) + step

        # Steady state: full in-range blocks accumulate without any mask work.
        @pl.when(block_id < last_block)
        def _():
            o_ref[...] += fold(vals)

        # Last / clamped out-of-range blocks: mask rows past the true row
        # count (also zeroes the block-padding garbage of a partial tile).
        @pl.when(block_id >= last_block)
        def _():
            row_in_tile = jax.lax.broadcasted_iota(jnp.int32, (tile_r, LANES), 0)
            global_row = block_id * tile_r + row_in_tile
            o_ref[...] += fold(jnp.where(global_row < rows, vals, 0.0))


def gray_loss(x):
    """1 / mean(|x - 0.5|), computed with a Pallas TPU reduction kernel."""
    numel = x.size
    itemsize = jnp.dtype(x.dtype).itemsize
    sub_mult = {4: 8, 2: 16, 1: 32}.get(itemsize, 8)   # min sublane tile / dtype

    flat = jnp.ravel(x)                 # contiguous input -> zero-copy view
    tail = numel % LANES
    main = numel - tail
    if tail:
        # Ragged tail (<128 elements): handled with plain jnp in the wrapper,
        # so the kernel never needs a full-tensor pad copy.
        tail_sum = jnp.sum(jnp.abs(flat[main:].astype(jnp.float32) - 0.5))
        flat = flat[:main]
    else:
        tail_sum = None

    rows = main // LANES
    if rows == 0:
        total = tail_sum if tail_sum is not None else jnp.float32(0.0)
        return jnp.float32(numel) / total

    x2d = flat.reshape(rows, LANES)

    num_cores = _num_parallel_cores()
    tile_r = min(MAX_TILE_R, _round_up(rows, sub_mult))
    n_blocks = pl.cdiv(rows, tile_r)
    blocks_per_core = pl.cdiv(n_blocks, num_cores)
    grid = (num_cores, blocks_per_core)
    need_mask = num_cores * blocks_per_core * tile_r != rows
    last_block = n_blocks - 1

    def x_index_map(c, i):
        blk = c * blocks_per_core + i
        # Clamp fully out-of-range blocks onto the last valid block; their
        # contribution is zeroed by the in-kernel row mask.
        return (jnp.minimum(blk, last_block), 0)

    kernel = functools.partial(
        _gray_loss_kernel, rows=rows, tile_r=tile_r,
        last_block=last_block, need_mask=need_mask)

    partials = pl.pallas_call(
        kernel,
        out_shape=jax.ShapeDtypeStruct((num_cores, 8, LANES), jnp.float32),
        grid_spec=pltpu.PrefetchScalarGridSpec(
            num_scalar_prefetch=0,
            grid=grid,
            in_specs=[pl.BlockSpec((tile_r, LANES), x_index_map)],
            out_specs=pl.BlockSpec((1, 8, LANES), lambda c, i: (c, 0, 0)),
        ),
        compiler_params=pltpu.CompilerParams(
            dimension_semantics=("parallel", "arbitrary"),
            vmem_limit_bytes=VMEM_LIMIT,
        ),
        cost_estimate=pl.CostEstimate(
            flops=3 * numel,
            transcendentals=0,
            bytes_accessed=numel * itemsize + num_cores * 8 * LANES * 4,
        ),
    )(x2d)

    total = jnp.sum(partials)
    if tail_sum is not None:
        total = total + tail_sum
    # f32(numel) is exact up to 2^24; beyond that relative error ~1e-7, which
    # is negligible for a scalar loss.  All-0.5 input -> total == 0 -> inf,
    # matching the 1/mean semantics of the reference.
    return jnp.float32(numel) / total


def gray_loss_ref(x):
    return 1.0 / jnp.mean(jnp.abs(x.astype(jnp.float32) - 0.5))


if __name__ == "__main__":
    key = jax.random.PRNGKey(0)
    x = jax.random.uniform(key, (2, 4, 16, 16), dtype=jnp.float32)

    out = jax.block_until_ready(gray_loss(x))
    ref = jax.block_until_ready(gray_loss_ref(x))

    assert jnp.allclose(out, ref, rtol=1e-5, atol=1e-5), (out, ref)
    print("KERNEL_OK")
</pallas_src>

<mosaic_0001>
module attributes {stable_mosaic.version = 11 : i64} {
  func.func @_gray_loss_kernel(%arg0: i32, %arg1: i32, %arg2: memref<16x128xf32, #tpu.memory_space<vmem>>, %arg3: memref<1x8x128xf32, #tpu.memory_space<vmem>>) attributes {dimension_semantics = [#tpu.dimension_semantics<parallel>, #tpu.dimension_semantics<arbitrary>], iteration_bounds = array<i64: 1, 1>, scalar_prefetch = 0 : i64, scratch_operands = 0 : i64, tpu.core_type = #tpu.core_type<tc>, window_params = [{transform_indices = @transform_0, window_bounds = array<i64: 16, 128>}, {transform_indices = @transform_1, window_bounds = array<i64: 1, 8, 128>}]} {
    %c0_i32 = arith.constant 0 : i32
    %0 = arith.cmpi eq, %arg1, %c0_i32 : i32
    %1 = arith.extui %0 : i1 to i32
    %c0_i32_0 = arith.constant 0 : i32
    %2 = arith.cmpi ne, %1, %c0_i32_0 : i32
    scf.if %2 {
      %cst_9 = arith.constant 0.000000e+00 : f32
      %13 = vector.broadcast %cst_9 : f32 to vector<1x8x128xf32>
      %c0_10 = arith.constant 0 : index
      %c0_11 = arith.constant 0 : index
      %c0_12 = arith.constant 0 : index
      %14 = vector.load %arg3[%c0_10, %c0_11, %c0_12] : memref<1x8x128xf32, #tpu.memory_space<vmem>>, vector<1x8x128xf32>
      tpu.vector_store %arg3[%c0_10, %c0_11, %c0_12], %13 {strides = array<i32>} : memref<1x8x128xf32, #tpu.memory_space<vmem>>, vector<1x8x128xf32>,
    } else {
    }
    %c0 = arith.constant 0 : index
    %c0_1 = arith.constant 0 : index
    %3 = vector.load %arg2[%c0, %c0_1] : memref<16x128xf32, #tpu.memory_space<vmem>>, vector<16x128xf32>
    %cst = arith.constant 5.000000e-01 : f32
    %4 = vector.broadcast %cst : f32 to vector<16x128xf32>
    %5 = arith.subf %3, %4 : vector<16x128xf32>
    %6 = math.absf %5 : vector<16x128xf32>
    %c0_2 = arith.constant 0 : index
    %c0_3 = arith.constant 0 : index
    %c0_4 = arith.constant 0 : index
    %7 = vector.load %arg3[%c0_2, %c0_3, %c0_4] : memref<1x8x128xf32, #tpu.memory_space<vmem>>, vector<1x8x128xf32>
    %8 = vector.shape_cast %6 : vector<16x128xf32> to vector<2x8x128xf32>
    %cst_5 = arith.constant dense<0.000000e+00> : vector<8x128xf32>
    %9 = vector.multi_reduction <add>, %8, %cst_5 [0] : vector<2x8x128xf32> to vector<8x128xf32>
    %10 = vector.shape_cast %9 : vector<8x128xf32> to vector<1x8x128xf32>
    %11 = arith.addf %7, %10 : vector<1x8x128xf32>
    %c0_6 = arith.constant 0 : index
    %c0_7 = arith.constant 0 : index
    %c0_8 = arith.constant 0 : index
    %12 = vector.load %arg3[%c0_6, %c0_7, %c0_8] : memref<1x8x128xf32, #tpu.memory_space<vmem>>, vector<1x8x128xf32>
    tpu.vector_store %arg3[%c0_6, %c0_7, %c0_8], %11 {strides = array<i32>} : memref<1x8x128xf32, #tpu.memory_space<vmem>>, vector<1x8x128xf32>,
    return
  }
  func.func @transform_0(%arg0: i32, %arg1: i32) -> (i32, i32) {
    %c1_i32 = arith.constant 1 : i32
    %0 = arith.muli %arg0, %c1_i32 : i32
    %1 = arith.addi %0, %arg1 : i32
    %c0_i32 = arith.constant 0 : i32
    %2 = arith.minsi %1, %c0_i32 : i32
    %c0_i32_0 = arith.constant 0 : i32
    %c0_i32_1 = arith.constant 0 : i32
    return %2, %c0_i32_0 : i32, i32
  }
  func.func @transform_1(%arg0: i32, %arg1: i32) -> (i32, i32, i32) {
    %c0_i32 = arith.constant 0 : i32
    %c0_i32_0 = arith.constant 0 : i32
    %c0_i32_1 = arith.constant 0 : i32
    return %arg0, %c0_i32, %c0_i32_0 : i32, i32, i32
  }
}

</mosaic_0001>

<bundles_post_ra>
// kernel: tpu_custom_call.1
= control target key start
LH: loop header
LB: loop body
LE: loop exit
PB: predicated region body
PF: predicated region fallthrough
CT: control target
= control target key end

     0   :  { %6 = vsyncpa [#allocation3], 0  ;;  %s136_s0 = inlined_call_operand.hbm [shape: f32[16,128], index: 0, kind: input, shape index: {}]   ;;  %s137_s1 = inlined_call_operand.hbm [shape: f32[1,8,128], index: 1, kind: output, shape index: {}]  }
   0x1   :  { %7 = vsyncpa [#allocation4], 0  ;;  %s116_s6 = smov [#allocation2]  }
   0x2   :  { %s19_s7 = sshll.u32 %s116_s6, 4  ;;  %s20_s7 = int_to_ptr.vmem [resolvable:$true] %s19_s7 }
   0x3   :  { %s80_s8 = scalar_lea.vmem %s20_s7, 256  ;;  %p85_p1 = scmp.lt.s32.totalorder %s20_s7, %s20_s7 }
   0x4   :  { %p81_p0 = scmp.ne.s32.totalorder %s20_s7, %s80_s8  ;;  %p86_p2 = scmp.lt.s32.totalorder %s80_s8, %s80_s8 }
   0x6   :  { %p87_p3 = por %p86_p2, %p85_p1 }
   0x8   :  { %p88_p4 = pnand %p87_p3, %p81_p0 }
   0xa   :  { %91 = shalt.err (!%p88_p4)
}
   0xb   :  { %s117_s9 = smov 128   ;;  %s118_s10 = smov 8  }
   0xc   :  { %25 = dma.hbm_to_vmem [thread:$0]  %s136_s0, 256, %s20_s7, [#allocation3], %s117_s9, %s117_s9, %s118_s10  }
   0xd   :  { %112 = dma.done.wait [#allocation3], 256  }
   0xe   :  { %113 = vsyncadd [#allocation3], 4294967040  ;;  %v38_v0 = vld [vmem:[#allocation2] sm:$0xff]  ;;  %v39_v1 = vld [vmem:[#allocation2 + $0x8] sm:$0xff]  ;;  %s119_s13 = smov [#allocation5]  }
   0xf   :  { %v65_v2 = vadd.f32 -0.5, %v38_v0  ;;  %v66_v3 = vadd.f32 -0.5, %v39_v1  ;;  %s54_s14 = sshll.u32 %s119_s13, 4  ;;  %s55_s14 = int_to_ptr.vmem [resolvable:$true] %s54_s14 }
  0x10   :  { %s92_s15 = scalar_lea.vmem %s55_s14, 128  ;;  %p97_p6 = scmp.lt.s32.totalorder %s55_s14, %s55_s14 }
  0x11   :  { %v42_v4 = vand.u32 2147483647, %v65_v2  ;;  %v43_v5 = vand.u32 2147483647, %v66_v3  ;;  %p93_p5 = scmp.ne.s32.totalorder %s55_s14, %s92_s15  ;;  %p98_p7 = scmp.lt.s32.totalorder %s92_s15, %s92_s15 }
  0x13   :  { %v45_v6 = vadd.f32 %v43_v5, %v42_v4  ;;  %p99_p8 = por %p98_p7, %p97_p6 }
  0x15   :  { %47 = vst [vmem:[#allocation5] sm:$0xff] %v45_v6  ;;  %p100_p9 = pnand %p99_p8, %p93_p5 }
  0x17   :  { %103 = shalt.err (!%p100_p9)
}
  0x18   :  { %57 = dma.vmem_to_hbm [thread:$0]  %s55_s14, 128, %s137_s1, [#allocation4]  }
  0x19   :  { %114 = dma.done.wait [#allocation4], 128  }
  0x1a   :  { %115 = vsyncadd [#allocation4], 4294967168 }
  0x1b   :  { %61 = vsyncpa [#allocation3], 1 }
  0x1c   :  { %62 = vsyncpa [#allocation4], 1 }

</bundles_post_ra>
